<compile_context>
chip_gen: v5e
topology: v5e:2x2
jax: 0.10.0
libtpu: 0.0.40
codegen_flags: <defaults>
</compile_context>

<pallas_src>
import math

import jax
import jax.numpy as jnp
from jax.experimental import pallas as pl
from jax.experimental.pallas import tpu as pltpu

LANE = 128      # padded feature width (in/out features = 32 -> padded to 128)
FEAT = 32       # logical feature dim of nn.Linear(32, 32)


# ----------------------------------------------------------------------------
# Pallas kernel: fused chain  h <- h @ W_aug_l   for l = 0..L-1
#   W_aug_l is the pre-transposed weight with the bias folded into row FEAT
#   and a ones-lane self-propagation element at [FEAT, FEAT].
# ----------------------------------------------------------------------------
def _linear_chain_kernel(x_ref, w_ref, o_ref, h_ref):
    """grid = (M_tiles,).
    x_ref: [tm, 32]       f32  input activations (unpadded lanes)
    w_ref: [L, 128, 128]  bf16 VMEM-resident augmented weights (all layers)
    o_ref: [tm, 128]      f32  final output
    h_ref: [tm, 128]      bf16 VMEM scratch: resident activation + ones lane
    """
    L = w_ref.shape[0]

    # Widen the 32-lane input into the 128-lane resident activation:
    #   lanes [0, 32) = x, lane 32 = 1.0 (bias lane), lanes (32, 128) = 0.
    h_ref[...] = jnp.zeros_like(h_ref)
    h_ref[:, 0:FEAT] = x_ref[...].astype(jnp.bfloat16)
    h_ref[:, FEAT:FEAT + 1] = jnp.ones((h_ref.shape[0], 1), jnp.bfloat16)

    # Layers 0 .. L-2: bf16 MXU matmul, f32 accumulate, bf16 resident store.
    if L <= 16:
        # Python unroll: L is static and small; gives LLO full visibility.
        for l in range(L - 1):
            h_ref[...] = jnp.dot(
                h_ref[...], w_ref[l],
                preferred_element_type=jnp.float32).astype(jnp.bfloat16)
    else:
        def layer_body(l, carry):
            h_ref[...] = jnp.dot(
                h_ref[...], w_ref[l],
                preferred_element_type=jnp.float32).astype(jnp.bfloat16)
            return carry
        jax.lax.fori_loop(0, L - 1, layer_body, 0)

    # Last layer: f32 result goes straight to HBM output (skip scratch store).
    o_ref[...] = jnp.dot(h_ref[...], w_ref[L - 1],
                         preferred_element_type=jnp.float32)


# ----------------------------------------------------------------------------
# One-time weight prep (outside the jitted forward)
# ----------------------------------------------------------------------------
def init_linear_between_params(key, linear_layers):
    """Torch-style params: per-layer weight [32, 32] (out, in), bias [32]."""
    ws, bs = [], []
    bound = 1.0 / math.sqrt(FEAT)                 # nn.Linear default init range
    for _ in range(linear_layers):
        key, kw, kb = jax.random.split(key, 3)
        ws.append(jax.random.uniform(kw, (FEAT, FEAT), jnp.float32, -bound, bound))
        bs.append(jax.random.uniform(kb, (FEAT,), jnp.float32, -bound, bound))
    return ws, bs


def pack_params(ws, bs):
    """Pre-transpose (x @ W.T), fold bias into row FEAT, add the ones-lane
    self-propagation element, zero-pad to a 128x128 tile, cast to bf16 and
    stack along a layer axis.  Done once, outside jit."""
    L = len(ws)
    w_aug = jnp.zeros((L, LANE, LANE), jnp.float32)
    for l, (w, b) in enumerate(zip(ws, bs)):
        w_aug = w_aug.at[l, :FEAT, :FEAT].set(w.T)   # x @ W.T
        w_aug = w_aug.at[l, FEAT, :FEAT].set(b)      # bias row (picked up by ones lane)
        w_aug = w_aug.at[l, FEAT, FEAT].set(1.0)     # ones lane self-propagates
    return w_aug.astype(jnp.bfloat16)


# ----------------------------------------------------------------------------
# Forward
# ----------------------------------------------------------------------------
def linear_between_forward(x, w_aug):
    """x: [..., 32] -> [..., 32], applying the L stacked Linear layers."""
    L = w_aug.shape[0]
    if L == 0:
        return x

    orig_shape = x.shape
    m = math.prod(orig_shape[:-1])
    x2 = x.reshape(m, FEAT).astype(jnp.float32)

    # M-tile selection: sublane multiples of 8; guarantee >= 2 tiles whenever
    # possible so the 'parallel' M axis engages both v7x TensorCores; cap at
    # 1024 rows (near HBM roofline, few-MiB VMEM footprint, no vmem_limit
    # override needed on any generation).
    if m <= 8:
        tm = 8
    elif m <= 2048:
        tm = -(-m // 16) * 8          # exactly two M tiles
    else:
        tm = 1024
    mp = -(-m // tm) * tm
    xp = x2 if mp == m else jnp.pad(x2, ((0, mp - m), (0, 0)))

    out = pl.pallas_call(
        _linear_chain_kernel,
        out_shape=jax.ShapeDtypeStruct((mp, LANE), jnp.float32),
        grid=(mp // tm,),
        in_specs=[
            # x tile: last dim 32 == full array dim (legal, unpadded lanes).
            pl.BlockSpec((tm, FEAT), lambda i: (i, 0)),
            # Full weight stack, constant block index -> fetched once, resident.
            pl.BlockSpec((L, LANE, LANE), lambda i: (0, 0, 0)),
        ],
        out_specs=pl.BlockSpec((tm, LANE), lambda i: (i, 0)),
        scratch_shapes=[pltpu.VMEM((tm, LANE), jnp.bfloat16)],
        compiler_params=pltpu.CompilerParams(
            dimension_semantics=("parallel",)),
    )(xp, w_aug)

    return out[:m, :FEAT].reshape(orig_shape)


if __name__ == "__main__":
    key = jax.random.PRNGKey(0)
    pkey, xkey = jax.random.split(key)

    linear_layers = 4
    ws, bs = init_linear_between_params(pkey, linear_layers)
    w_aug = pack_params(ws, bs)                   # one-time prep, outside jit

    # Small shapes consistent with the module: [..., 32] hidden features.
    x = jax.random.normal(xkey, (2, 8, FEAT), jnp.float32)

    fwd = jax.jit(linear_between_forward)
    y = fwd(x, w_aug)
    jax.block_until_ready(y)

    # Pure-JAX f32 reference (bf16 MXU operands + bf16 bias -> loose tolerance).
    y_ref = x
    for w, b in zip(ws, bs):
        y_ref = y_ref @ w.T + b

    assert y.shape == x.shape, y.shape
    assert bool(jnp.all(jnp.isfinite(y)))
    assert bool(jnp.allclose(y, y_ref, rtol=5e-2, atol=5e-2)), \
        float(jnp.max(jnp.abs(y - y_ref)))
    print("KERNEL_OK")
</pallas_src>

<mosaic_0001>
module attributes {stable_mosaic.version = 11 : i64} {
  func.func @_linear_chain_kernel(%arg0: i32, %arg1: memref<8x32xf32, #tpu.memory_space<vmem>>, %arg2: memref<4x128x128xbf16, #tpu.memory_space<vmem>>, %arg3: memref<8x128xf32, #tpu.memory_space<vmem>>, %arg4: memref<8x128xbf16, #tpu.memory_space<vmem>>) attributes {dimension_semantics = [#tpu.dimension_semantics<parallel>], iteration_bounds = array<i64: 2>, scalar_prefetch = 0 : i64, scratch_operands = 1 : i64, tpu.core_type = #tpu.core_type<tc>, window_params = [{transform_indices = @transform_0, window_bounds = array<i64: 8, 32>}, {pipeline_mode = #tpu.pipeline_mode<synchronous>, transform_indices = @transform_1, window_bounds = array<i64: 4, 128, 128>}, {transform_indices = @transform_2, window_bounds = array<i64: 8, 128>}]} {
    %cst = arith.constant 0.000000e+00 : bf16
    %0 = vector.broadcast %cst : bf16 to vector<8x128xbf16>
    %c0 = arith.constant 0 : index
    %c0_0 = arith.constant 0 : index
    %1 = vector.load %arg4[%c0, %c0_0] : memref<8x128xbf16, #tpu.memory_space<vmem>>, vector<8x128xbf16>
    tpu.vector_store %arg4[%c0, %c0_0], %0 {strides = array<i32>} : memref<8x128xbf16, #tpu.memory_space<vmem>>, vector<8x128xbf16>,
    %c0_1 = arith.constant 0 : index
    %c0_2 = arith.constant 0 : index
    %2 = vector.load %arg1[%c0_1, %c0_2] : memref<8x32xf32, #tpu.memory_space<vmem>>, vector<8x32xf32>
    %3 = arith.truncf %2 : vector<8x32xf32> to vector<8x32xbf16>
    %c0_3 = arith.constant 0 : index
    %c0_4 = arith.constant 0 : index
    %4 = vector.load %arg4[%c0_3, %c0_4] : memref<8x128xbf16, #tpu.memory_space<vmem>>, vector<8x32xbf16>
    tpu.vector_store %arg4[%c0_3, %c0_4], %3 {strides = array<i32>} : memref<8x128xbf16, #tpu.memory_space<vmem>>, vector<8x32xbf16>,
    %cst_5 = arith.constant 1.000000e+00 : bf16
    %5 = vector.broadcast %cst_5 : bf16 to vector<8x1xbf16>
    %c0_6 = arith.constant 0 : index
    %c32 = arith.constant 32 : index
    %6 = vector.load %arg4[%c0_6, %c32] : memref<8x128xbf16, #tpu.memory_space<vmem>>, vector<8x1xbf16>
    tpu.vector_store %arg4[%c0_6, %c32], %5 {strides = array<i32>} : memref<8x128xbf16, #tpu.memory_space<vmem>>, vector<8x1xbf16>,
    %c0_7 = arith.constant 0 : index
    %c0_8 = arith.constant 0 : index
    %7 = vector.load %arg4[%c0_7, %c0_8] : memref<8x128xbf16, #tpu.memory_space<vmem>>, vector<8x128xbf16>
    %c0_9 = arith.constant 0 : index
    %c0_10 = arith.constant 0 : index
    %c0_11 = arith.constant 0 : index
    %8 = vector.load %arg2[%c0_9, %c0_10, %c0_11] : memref<4x128x128xbf16, #tpu.memory_space<vmem>>, vector<1x128x128xbf16>
    %9 = vector.shape_cast %8 : vector<1x128x128xbf16> to vector<128x128xbf16>
    %cst_12 = arith.constant dense<0.000000e+00> : vector<8x128xf32>
    %10 = tpu.matmul %7, %9, %cst_12 {dimension_numbers = #tpu.dot_dimension_numbers<[1], [0], [0], [1], [0, 0, 1, 1], [], []>} : vector<8x128xbf16>, vector<128x128xbf16>, vector<8x128xf32> -> vector<8x128xf32>
    %11 = arith.truncf %10 : vector<8x128xf32> to vector<8x128xbf16>
    %c0_13 = arith.constant 0 : index
    %c0_14 = arith.constant 0 : index
    %12 = vector.load %arg4[%c0_13, %c0_14] : memref<8x128xbf16, #tpu.memory_space<vmem>>, vector<8x128xbf16>
    tpu.vector_store %arg4[%c0_13, %c0_14], %11 {strides = array<i32>} : memref<8x128xbf16, #tpu.memory_space<vmem>>, vector<8x128xbf16>,
    %c0_15 = arith.constant 0 : index
    %c0_16 = arith.constant 0 : index
    %13 = vector.load %arg4[%c0_15, %c0_16] : memref<8x128xbf16, #tpu.memory_space<vmem>>, vector<8x128xbf16>
    %c1 = arith.constant 1 : index
    %c0_17 = arith.constant 0 : index
    %c0_18 = arith.constant 0 : index
    %14 = vector.load %arg2[%c1, %c0_17, %c0_18] : memref<4x128x128xbf16, #tpu.memory_space<vmem>>, vector<1x128x128xbf16>
    %15 = vector.shape_cast %14 : vector<1x128x128xbf16> to vector<128x128xbf16>
    %cst_19 = arith.constant dense<0.000000e+00> : vector<8x128xf32>
    %16 = tpu.matmul %13, %15, %cst_19 {dimension_numbers = #tpu.dot_dimension_numbers<[1], [0], [0], [1], [0, 0, 1, 1], [], []>} : vector<8x128xbf16>, vector<128x128xbf16>, vector<8x128xf32> -> vector<8x128xf32>
    %17 = arith.truncf %16 : vector<8x128xf32> to vector<8x128xbf16>
    %c0_20 = arith.constant 0 : index
    %c0_21 = arith.constant 0 : index
    %18 = vector.load %arg4[%c0_20, %c0_21] : memref<8x128xbf16, #tpu.memory_space<vmem>>, vector<8x128xbf16>
    tpu.vector_store %arg4[%c0_20, %c0_21], %17 {strides = array<i32>} : memref<8x128xbf16, #tpu.memory_space<vmem>>, vector<8x128xbf16>,
    %c0_22 = arith.constant 0 : index
    %c0_23 = arith.constant 0 : index
    %19 = vector.load %arg4[%c0_22, %c0_23] : memref<8x128xbf16, #tpu.memory_space<vmem>>, vector<8x128xbf16>
    %c2 = arith.constant 2 : index
    %c0_24 = arith.constant 0 : index
    %c0_25 = arith.constant 0 : index
    %20 = vector.load %arg2[%c2, %c0_24, %c0_25] : memref<4x128x128xbf16, #tpu.memory_space<vmem>>, vector<1x128x128xbf16>
    %21 = vector.shape_cast %20 : vector<1x128x128xbf16> to vector<128x128xbf16>
    %cst_26 = arith.constant dense<0.000000e+00> : vector<8x128xf32>
    %22 = tpu.matmul %19, %21, %cst_26 {dimension_numbers = #tpu.dot_dimension_numbers<[1], [0], [0], [1], [0, 0, 1, 1], [], []>} : vector<8x128xbf16>, vector<128x128xbf16>, vector<8x128xf32> -> vector<8x128xf32>
    %23 = arith.truncf %22 : vector<8x128xf32> to vector<8x128xbf16>
    %c0_27 = arith.constant 0 : index
    %c0_28 = arith.constant 0 : index
    %24 = vector.load %arg4[%c0_27, %c0_28] : memref<8x128xbf16, #tpu.memory_space<vmem>>, vector<8x128xbf16>
    tpu.vector_store %arg4[%c0_27, %c0_28], %23 {strides = array<i32>} : memref<8x128xbf16, #tpu.memory_space<vmem>>, vector<8x128xbf16>,
    %c0_29 = arith.constant 0 : index
    %c0_30 = arith.constant 0 : index
    %25 = vector.load %arg4[%c0_29, %c0_30] : memref<8x128xbf16, #tpu.memory_space<vmem>>, vector<8x128xbf16>
    %c3 = arith.constant 3 : index
    %c0_31 = arith.constant 0 : index
    %c0_32 = arith.constant 0 : index
    %26 = vector.load %arg2[%c3, %c0_31, %c0_32] : memref<4x128x128xbf16, #tpu.memory_space<vmem>>, vector<1x128x128xbf16>
    %27 = vector.shape_cast %26 : vector<1x128x128xbf16> to vector<128x128xbf16>
    %cst_33 = arith.constant dense<0.000000e+00> : vector<8x128xf32>
    %28 = tpu.matmul %25, %27, %cst_33 {dimension_numbers = #tpu.dot_dimension_numbers<[1], [0], [0], [1], [0, 0, 1, 1], [], []>} : vector<8x128xbf16>, vector<128x128xbf16>, vector<8x128xf32> -> vector<8x128xf32>
    %c0_34 = arith.constant 0 : index
    %c0_35 = arith.constant 0 : index
    %29 = vector.load %arg3[%c0_34, %c0_35] : memref<8x128xf32, #tpu.memory_space<vmem>>, vector<8x128xf32>
    tpu.vector_store %arg3[%c0_34, %c0_35], %28 {strides = array<i32>} : memref<8x128xf32, #tpu.memory_space<vmem>>, vector<8x128xf32>,
    return
  }
  func.func @transform_0(%arg0: i32) -> (i32, i32) {
    %c0_i32 = arith.constant 0 : i32
    %c0_i32_0 = arith.constant 0 : i32
    return %arg0, %c0_i32 : i32, i32
  }
  func.func @transform_1(%arg0: i32) -> (i32, i32, i32) {
    %c0_i32 = arith.constant 0 : i32
    %c0_i32_0 = arith.constant 0 : i32
    %c0_i32_1 = arith.constant 0 : i32
    %c0_i32_2 = arith.constant 0 : i32
    return %c0_i32, %c0_i32_0, %c0_i32_1 : i32, i32, i32
  }
  func.func @transform_2(%arg0: i32) -> (i32, i32) {
    %c0_i32 = arith.constant 0 : i32
    %c0_i32_0 = arith.constant 0 : i32
    return %arg0, %c0_i32 : i32, i32
  }
}

</mosaic_0001>

<bundles_post_ra>
// kernel: linear_between_forward.1
= control target key start
LH: loop header
LB: loop body
LE: loop exit
PB: predicated region body
PF: predicated region fallthrough
CT: control target
= control target key end

     0   :  { %7 = vsyncpa [#allocation4], 0  ;;  %s1033_s0 = inlined_call_operand.hbm [shape: f32[16,32], index: 0, kind: input, shape index: {}]   ;;  %s1034_s1 = inlined_call_operand.hbm [shape: bf16[4,128,128], index: 1, kind: input, shape index: {}]   ;;  %s1035_s2 = inlined_call_operand.vmem [shape: f32[16,128], index: 2, kind: output, shape index: {}]  }
   0x1   :  { %9 = vsyncpa [#allocation4 + $0x1], 0 }
   0x2   :  { %10 = vsyncpa [#allocation6], 0  ;;  %s930_s9 = smov 0   ;;  %s932_s10 = smov 0  }
   0x3   :  { %s934_s11 = smov 0   ;;  %s936_s12 = smov 0  }
   0x4 LB: > { %s105_s15 = sshll.u32 %s1034_s1, 4  ;;  %s952_s16 = sadd.s32 4294967295, %s908_s12   ;;  %s908_s12 = sphi %s936_s12, %s1042_s12   ;;  %s904_s11 = sphi %s934_s11, %s1041_s11   ;;  %s900_s10 = sphi %s932_s10, %s1040_s10   ;;  %s896_s9 = sphi %s930_s9, %s1039_s9   ;;  %s106_s15 = int_to_ptr.hbm [resolvable:$true] %s105_s15 }
   0x5   : > { %p585_p0 = scmp.ge.s32.totalorder %s908_s12, 1  ;;  %p37_p1 = scmp.eq.s32.totalorder %s952_s16, 0 }
   0x6   : > { %p94_p2 = scmp.lt.s32.totalorder %s908_s12, 3  ;;  %s910_s18 = smov [#allocation5]  }
   0x7   : > { %s107_s19 = sshll.u32 %s910_s18, 4  ;;  %s911_s20 = smov 64   ;;  %s108_s19 = int_to_ptr.vmem [resolvable:$true] %s107_s19 }
   0x8   : > { %p957_p3 = pnand %p585_p0, %p94_p2  ;;  %s912_s21 = smov 4  }
   0x9   : > { %s966_s22 = sadd.s32 1, %s908_s12   ;;  %s23_s24 = sadd.s32 1, %s904_s11 }
   0xa   : > { %p762_p4 = pneg %p957_p3  ;;  %s20_s23 = ssub.s32 %s908_s12, %s966_s22 }
   0xb   : > { %p21_p6 = scmp.eq.s32.totalorder %s20_s23, 0  ;;  %p30_p7 = scmp.ne.s32.totalorder %s904_s11, %s900_s10 }
   0xc   : > { %p763_p5 = pnand %p762_p4, %p37_p1  ;;  %p31_p8 = scmp.eq.s32.totalorder %s908_s12, 0 }
   0xd   : > { %p36_p9 = scmp.ne.s32.totalorder %s900_s10, %s896_s9  ;;  %p771_p12 = scmp.lt.s32.totalorder %s908_s12, 2 }
   0xe   : > { %765 = dma.hbm_to_vmem [thread:$0]  (!%p763_p5), %s106_s15, 4096, %s108_s19, [#allocation6], %s911_s20, %s911_s20, %s912_s21  }
   0xf   : > { %s976_s25 = scalar_select %p21_p6, %s904_s11, %s23_s24  }
  0x10   : > { %p32_p10 = por %p31_p8, %p30_p7  ;;  %p980_p11 = por %p37_p1, %p36_p9 }
  0x11   : > { %s121_s27 = sand.u32 1, %s904_s11   ;;  %s589_s29 = sshll.u32 %s908_s12, 3 }
  0x12   : > { %s588_s28 = sshll.u32 %s121_s27, 3  ;;  %s129_s4 = scalar_lea.hbm %s1033_s0, %s589_s29 }
  0x13   : > { %s125_s5 = scalar_lea.vmem [#allocation3], %s588_s28  ;;  %s131_s7 = sshll.u32 %s129_s4, 4  ;;  %s132_s7 = int_to_ptr.hbm [resolvable:$true] %s131_s7 }
  0x14   : > { %s133_s6 = sshll.u32 %s125_s5, 4  ;;  %p990_p13 = pnand %p771_p12, %p32_p10  ;;  %s134_s6 = int_to_ptr.vmem [resolvable:$true] %s133_s6 }
  0x15   : > { %s122_s9 = scalar_lea.sflag [#allocation4], %s121_s27  ;;  %s840_s13 = sshra.s32 %s132_s7, 4  ;;  %s841_s13 = int_to_ptr.hbm [resolvable:$true] %s840_s13 }
  0x16   : > { %s842_s14 = scalar_lea.hbm %s841_s13, 8  ;;  %p844_p2 = pneg %p990_p13 }
  0x17   : > { %p843_p0 = scmp.ne.s32.totalorder %s841_s13, %s842_s14  ;;  %s847_s18 = scalar_lea.hbm %s1033_s0, 16 }
  0x18   : > { %p848_p6 = scmp.lt.s32.totalorder %s841_s13, %s1033_s0  ;;  %p849_p7 = scmp.lt.s32.totalorder %s847_s18, %s842_s14 }
  0x19   : > { %p845_p4 = pnand %p844_p2, %p843_p0 }
  0x1a   : > { %p850_p8 = por %p849_p7, %p848_p6 }
  0x1b   : > { %p846_p5 = pneg %p845_p4 }
  0x1d   : > { %p851_p9 = pnand %p850_p8, %p846_p5 }
  0x1f   : > { %854 = shalt.err (!%p851_p9)
}
  0x20   : > { %769 = dma.hbm_to_vmem [thread:$0]  (!%p990_p13), %s132_s7, 128, %s134_s6, %s122_s9  }
  0x21   : > { %142 = sbr.rel (%p957_p3) target bundleno = 627 (0x273), region = 28  ;;  %s144_s21 = sand.u32 (!%p957_p3), 1, %s900_s10  }
  0x22   : > { %s591_s23 = sshll.u32 (!%p957_p3), %s144_s21, 3  ;;  %s145_s24 = scalar_lea.sflag (!%p957_p3), [#allocation4], %s144_s21 }
  0x23   : > { %s148_s27 = scalar_lea.vmem (!%p957_p3), [#allocation3], %s591_s23 }
  0x26   : > { %887 = dma.done.wait (%p980_p11), %s145_s24, 128  }
  0x27   : > { %889 = vsyncadd (%p980_p11), %s145_s24, 4294967168 }
  0x28   : > { %891 = dma.done.wait (%p37_p1), [#allocation6], 4096  }
  0x29   : > { %893 = vsyncadd (%p37_p1), [#allocation6], 4294963200  ;;  %v913_v0 = vmov 0   ;;  %v731_v1 = vld [vmem:[#allocation5 + $0x38] sm:$0xff]  ;;  %v730_v2 = vld [vmem:[#allocation5 + $0x30] sm:$0xff]  ;;  %vm183_vm0 = vcmask 257024  }
  0x2a   : > { %180 = vst [vmem:[#allocation2] sm:$0xf] %v913_v0  ;;  %252 = vmatpush.bf16.msra.mxu0 %v731_v1  ;;  %v181_v3 = vld [vmem:[%s148_s27] sm:$0xff]  ;;  %vm185_vm1 = vcmask 265472   ;;  %v729_v7 = vld [vmem:[#allocation5 + $0x28] sm:$0xff]  ;;  %v728_v10 = vld [vmem:[#allocation5 + $0x20] sm:$0xff] }
  0x2b   : > { %v182_v4 = vpack.c.bf16 %v181_v3, %v181_v3  ;;  %v739_v5 = vld [vmem:[#allocation5 + $0x78] sm:$0xff]  ;;  %v738_v6 = vld [vmem:[#allocation5 + $0x70] sm:$0xff]  ;;  %v914_v8 = vmov 1065369472   ;;  %v737_v9 = vld [vmem:[#allocation5 + $0x68] sm:$0xff]  ;;  %p174_p1 = scmp.lt.s32.totalorder %s952_s16, 1 }
  0x2c   : > { %333 = vmatpush.bf16.msra.mxu1 %v739_v5  ;;  %v736_v11 = vld [vmem:[#allocation5 + $0x60] sm:$0xff]  ;;  %v727_v12 = vld [vmem:[#allocation5 + $0x18] sm:$0xff]  ;;  %v726_v14 = vld [vmem:[#allocation5 + $0x10] sm:$0xff] }
  0x2d   : > { %184 = vst.msk [vmem:[#allocation2] sm:$0xf] %vm183_vm0, %v182_v4  ;;  %v735_v13 = vld [vmem:[#allocation5 + $0x58] sm:$0xff]  ;;  %v725_v15 = vld [vmem:[#allocation5 + $0x8] sm:$0xff]  ;;  %v724_v16 = vld [vmem:[#allocation5] sm:$0xff]  ;;  %s1044_s16 = smov (!%p174_p1, %s952_s16), 1 }
  0x2e   : > { %253 = vmatpush.bf16.msra.mxu0 %v730_v2  ;;  %186 = vst.msk [vmem:[#allocation2] sm:$0xf] %vm185_vm1, %v914_v8  ;;  %v734_v18 = vld [vmem:[#allocation5 + $0x50] sm:$0xff]  ;;  %v733_v19 = vld [vmem:[#allocation5 + $0x48] sm:$0xff]  ;;  %v732_v20 = vld [vmem:[#allocation5 + $0x40] sm:$0xff]  ;;  %s593_s17 = sshll.u32 %s1044_s16, 3 }
  0x2f   : > { %v747_v21 = vld [vmem:[#allocation5 + $0xb8] sm:$0xff]  ;;  %v746_v22 = vld [vmem:[#allocation5 + $0xb0] sm:$0xff]  ;;  %v745_v23 = vld [vmem:[#allocation5 + $0xa8] sm:$0xff]  ;;  %s177_s29 = scalar_lea.vmem %s1035_s2, %s593_s17 }
  0x30   : > { %334 = vmatpush.bf16.msra.mxu1 %v738_v6  ;;  %414 = vmatpush.bf16.msra.mxu2 %v747_v21  ;;  %v744_v24 = vld [vmem:[#allocation5 + $0xa0] sm:$0xff]  ;;  %v743_v25 = vld [vmem:[#allocation5 + $0x98] sm:$0xff]  ;;  %v742_v30 = vld [vmem:[#allocation5 + $0x90] sm:$0xff] }
  0x31   : > { %v741_v31 = vld [vmem:[#allocation5 + $0x88] sm:$0xff]  ;;  %v740_v32 = vld [vmem:[#allocation5 + $0x80] sm:$0xff]  ;;  %v755_v33 = vld [vmem:[#allocation5 + $0xf8] sm:$0xff] }
  0x32   : > { %254 = vmatpush.bf16.msra.mxu0 %v729_v7  ;;  %495 = vmatpush.bf16.msra.mxu3 %v755_v33  ;;  %v754_v34 = vld [vmem:[#allocation5 + $0xf0] sm:$0xff]  ;;  %v753_v35 = vld [vmem:[#allocation5 + $0xe8] sm:$0xff]  ;;  %v752_v36 = vld [vmem:[#allocation5 + $0xe0] sm:$0xff] }
  0x33   : > { %v751_v37 = vld [vmem:[#allocation5 + $0xd8] sm:$0xff]  ;;  %v750_v42 = vld [vmem:[#allocation5 + $0xd0] sm:$0xff]  ;;  %v749_v43 = vld [vmem:[#allocation5 + $0xc8] sm:$0xff] }
  0x34   : > { %335 = vmatpush.bf16.msra.mxu1 %v737_v9  ;;  %415 = vmatpush.bf16.msra.mxu2 %v746_v22  ;;  %v748_v44 = vld [vmem:[#allocation5 + $0xc0] sm:$0xff] }
  0x35   : > { %v187_v17 = vld [vmem:[#allocation2] sm:$0xf] }
  0x36   : > { %255 = vmatpush.bf16.msra.mxu0 %v728_v10  ;;  %496 = vmatpush.bf16.msra.mxu3 %v754_v34 }
  0x38   : > { %336 = vmatpush.bf16.msra.mxu1 %v736_v11  ;;  %416 = vmatpush.bf16.msra.mxu2 %v745_v23 }
  0x3a   : > { %256 = vmatpush.bf16.msra.mxu0 %v727_v12  ;;  %497 = vmatpush.bf16.msra.mxu3 %v753_v35 }
  0x3c   : > { %337 = vmatpush.bf16.msra.mxu1 %v735_v13  ;;  %417 = vmatpush.bf16.msra.mxu2 %v744_v24 }
  0x3e   : > { %257 = vmatpush.bf16.msra.mxu0 %v726_v14  ;;  %498 = vmatpush.bf16.msra.mxu3 %v752_v36 }
  0x40   : > { %338 = vmatpush.bf16.msra.mxu1 %v734_v18  ;;  %418 = vmatpush.bf16.msra.mxu2 %v743_v25 }
  0x42   : > { %258 = vmatpush.bf16.msra.mxu0 %v725_v15  ;;  %499 = vmatpush.bf16.msra.mxu3 %v751_v37 }
  0x44   : > { %339 = vmatpush.bf16.msra.mxu1 %v733_v19  ;;  %419 = vmatpush.bf16.msra.mxu2 %v742_v30 }
  0x46   : > { %259 = vmatpush.bf16.msra.mxu0 %v724_v16  ;;  %500 = vmatpush.bf16.msra.mxu3 %v750_v42 }
  0x48   : > { %340 = vmatpush.bf16.msra.mxu1 %v732_v20  ;;  %420 = vmatpush.bf16.msra.mxu2 %v741_v31 }
  0x49   : > { %260 = vmatmul.bf16.vlgmr.msra.gmra.mxu0 %v187_v17 }
  0x4a   : > { %501 = vmatpush.bf16.msra.mxu3 %v749_v43 }
  0x4c   : > { %421 = vmatpush.bf16.msra.mxu2 %v740_v32 }
  0x4e   : > { %502 = vmatpush.bf16.msra.mxu3 %v748_v44 }
  0xc6   : > { %v261_v26 = vpop.f32.mrf.mxu0 }
  0xc7   : > { %v265_v27 = vpack.c.bf16 %v261_v26, %v261_v26 }
  0xc9   : > { %266 = vst [vmem:[#allocation2] sm:$0xf] %v265_v27 }
  0xce   : > { %v263_v28 = vpop.f32.mrf.mxu0 }
  0xd0   : > { %v267_v29 = vld [vmem:[#allocation2] sm:$0xf] }
  0xd1   : > { %341 = vmatmul.bf16.vlgmr.msra.gmra.mxu1 %v267_v29 }
 0x14e   : > { %v342_v38 = vpop.f32.mrf.mxu1 }
 0x14f   : > { %v346_v39 = vpack.c.bf16 %v342_v38, %v342_v38 }
 0x151   : > { %347 = vst [vmem:[#allocation2] sm:$0xf] %v346_v39 }
 0x156   : > { %v344_v40 = vpop.f32.mrf.mxu1 }
 0x158   : > { %v348_v41 = vld [vmem:[#allocation2] sm:$0xf] }
 0x159   : > { %422 = vmatmul.bf16.vlgmr.msra.gmra.mxu2 %v348_v41 }
 0x1dc   : > { %v423_v45 = vpop.f32.mrf.mxu2 }
 0x1dd   : > { %v427_v46 = vpack.c.bf16 %v423_v45, %v423_v45 }
 0x1df   : > { %428 = vst [vmem:[#allocation2] sm:$0xf] %v427_v46 }
 0x1e4   : > { %v425_v47 = vpop.f32.mrf.mxu2 }
 0x1e6   : > { %v429_v48 = vld [vmem:[#allocation2] sm:$0xf] }
 0x1e7   : > { %503 = vmatmul.bf16.vlgmr.msra.gmra.mxu3 %v429_v48 }
 0x26a   : > { %v504_v49 = vpop.f32.mrf.mxu3 }
 0x26b   : > { %508 = vst [vmem:[%s177_s29] sm:$0xff] %v504_v49 }
 0x272   : > { %v506_v50 = vpop.f32.mrf.mxu3 }
 0x273 PF: > { %p13_p3 = scmp.ge.s32.totalorder %s966_s22, 4   ;;  %s1039_s9 = smov %s900_s10 }
 0x274   : > { %s1040_s10 = smov %s904_s11  ;;  %s1041_s11 = smov %s976_s25 }
 0x275   : > { %s1042_s12 = smov %s966_s22  ;;  %15 = sbr.rel (!%p13_p3) target bundleno = 4 (0x4), region = 75 }
 0x27a   :  { %528 = vsyncpa [#allocation4], 1 }
 0x27b   :  { %530 = vsyncpa [#allocation4 + $0x1], 1 }
 0x27c   :  { %531 = vsyncpa [#allocation6], 1 }

</bundles_post_ra>
